<compile_context>
chip_gen: v6e
topology: v6e:2x2x1
jax: 0.10.0
libtpu: 0.0.40
codegen_flags: <defaults>
</compile_context>

<pallas_src>
import functools

import jax
import jax.numpy as jnp
from jax.experimental import pallas as pl
from jax.experimental.pallas import tpu as pltpu

_MIB = 1024 * 1024
_SMALL_BYTES = 8 * _MIB        # below this, fused XLA floor is strictly better
_MIN_GRID_STEPS = 8            # keep >= 4 grid steps per TensorCore for DMA overlap


def _floor_kernel(x_ref, o_ref):
    # Elementwise floor on the current VMEM tile (VPU op).
    o_ref[...] = jnp.floor(x_ref[...])


def _round_up(x, m):
    return (x + m - 1) // m * m


@functools.lru_cache(maxsize=None)
def _vmem_capacity_bytes():
    """Physical VMEM capacity of the local TPU (conservative default if unknown)."""
    try:
        cap = int(pltpu.get_tpu_info().vmem_capacity_bytes)
        if cap > 0:
            return cap
    except Exception:
        pass
    return 64 * _MIB   # conservative (v7x per-TC VMEM)


def _tile_bytes_and_vmem_limit():
    cap = _vmem_capacity_bytes()
    if cap >= 96 * _MIB:          # v5e / v6e class parts (128 MiB physical VMEM)
        tile_bytes = 8 * _MIB
    else:                         # v7x class parts (64 MiB physical VMEM per TC)
        tile_bytes = 6 * _MIB
    # in + out, double-buffered = 4 * tile_bytes; add headroom but never request
    # more than 3/4 of physical VMEM.
    vmem_limit = min(cap * 3 // 4, 4 * tile_bytes + 16 * _MIB)
    return tile_bytes, vmem_limit


def _pick_lanes(n, lanes=None):
    """Widest lane multiple that divides numel (free reshape), or None if ragged."""
    if lanes is not None:
        return lanes if (n % lanes == 0) else None
    for cand in (1024, 512, 256, 128):
        if n % cand == 0:
            return cand
    return None


def _quantize_2d(x2d, tile_rows, vmem_limit_bytes, donate):
    """Apply floor over a (R, L) float array with a 1-D row grid."""
    R, L = x2d.shape
    return pl.pallas_call(
        _floor_kernel,
        out_shape=jax.ShapeDtypeStruct((R, L), x2d.dtype),
        grid_spec=pltpu.PrefetchScalarGridSpec(
            num_scalar_prefetch=0,
            grid=(pl.cdiv(R, tile_rows),),
            in_specs=[pl.BlockSpec((tile_rows, L), lambda i: (i, 0))],
            out_specs=pl.BlockSpec((tile_rows, L), lambda i: (i, 0)),
        ),
        compiler_params=pltpu.CompilerParams(
            dimension_semantics=("parallel",),       # shard rows across TCs on v7x
            vmem_limit_bytes=vmem_limit_bytes,       # per-generation scoped limit
        ),
        # Reuse the input HBM buffer for the output when the caller donates it.
        input_output_aliases=({0: 0} if donate else {}),
    )(x2d)


def quantize_layer(data, quantize=True, use_pallas=None, tile_rows=None,
                   lanes=None, donate_input=False):
    """JAX/Pallas equivalent of sinabs QuantizeLayer.forward.

    data: array of any shape (e.g. NCHW). Returns floor(data) if quantize else
    data unchanged. `use_pallas`, `tile_rows`, `lanes` are testing knobs; by
    default small / ragged inputs use a fused XLA floor. `donate_input=True`
    aliases the input buffer to the output (pair with caller-side donation).
    """
    if not quantize:
        return data
    if not jnp.issubdtype(data.dtype, jnp.floating):
        # floor of integer data is identity (and jnp.floor would change dtype).
        return data

    itemsize = jnp.dtype(data.dtype).itemsize
    n = data.size
    nbytes = n * itemsize
    if use_pallas is None:
        use_pallas = nbytes >= _SMALL_BYTES
    if not use_pallas or n == 0:
        return jnp.floor(data)

    L = _pick_lanes(n, lanes)
    if L is None:
        # Ragged numel (not a multiple of 128): pad + kernel + slice would triple
        # HBM traffic, so the fused XLA floor is strictly better here.
        return jnp.floor(data)

    rows = n // L
    tile_bytes, vmem_limit = _tile_bytes_and_vmem_limit()

    # Sublane multiple: 8 for 32-bit, 16 for 16-bit, 32 for 8-bit dtypes.
    sub = max(8, 32 // itemsize)
    if tile_rows is None:
        tile_rows = (tile_bytes // (L * itemsize)) // sub * sub
    else:
        tile_rows = _round_up(tile_rows, sub)
    # Keep >= _MIN_GRID_STEPS grid steps so read/write DMA streams stay overlapped.
    tile_rows = min(tile_rows, _round_up(-(-rows // _MIN_GRID_STEPS), sub))
    # Never bigger than needed for the whole array, never below the sublane minimum.
    tile_rows = max(sub, min(tile_rows, _round_up(rows, sub)))

    out2d = _quantize_2d(data.reshape(rows, L), tile_rows, vmem_limit, donate_input)
    return out2d.reshape(data.shape)


if __name__ == "__main__":
    key = jax.random.PRNGKey(0)

    # Small NCHW input consistent with typical sinabs usage.
    x = jax.random.uniform(
        key, (2, 4, 16, 16), dtype=jnp.float32, minval=-5.0, maxval=5.0
    )
    ref = jnp.floor(x)

    # 1) Force the Pallas path (widest-lane reshape, single grid step).
    y = jax.block_until_ready(quantize_layer(x, quantize=True, use_pallas=True))
    assert y.shape == x.shape and y.dtype == x.dtype
    assert bool(jnp.all(y == ref))

    # 2) Multi-step grid: force 128 lanes + tile_rows=8 -> 2 grid steps over 16 rows.
    y2 = jax.block_until_ready(
        quantize_layer(x, quantize=True, use_pallas=True, tile_rows=8, lanes=128)
    )
    assert bool(jnp.all(y2 == ref))

    # 3) Aliased-output variant under jit (input_output_aliases={0: 0}).
    f_donate = jax.jit(
        lambda a: quantize_layer(a, quantize=True, use_pallas=True, donate_input=True)
    )
    y3 = jax.block_until_ready(f_donate(x))
    assert bool(jnp.all(y3 == ref))

    # 4) Ragged numel (not a multiple of 128) -> fused XLA floor fallback.
    xr = jax.random.uniform(
        jax.random.PRNGKey(1), (3, 5, 17, 13), dtype=jnp.float32,
        minval=-5.0, maxval=5.0
    )
    yr = jax.block_until_ready(quantize_layer(xr, quantize=True, use_pallas=True))
    assert yr.shape == xr.shape and yr.dtype == xr.dtype
    assert bool(jnp.all(yr == jnp.floor(xr)))

    # 5) Default heuristic path for small inputs (fused XLA floor).
    y_small = jax.block_until_ready(quantize_layer(x, quantize=True))
    assert bool(jnp.all(y_small == ref))

    # 6) quantize=False is identity; integer inputs pass through unchanged.
    assert bool(jnp.all(quantize_layer(x, quantize=False) == x))
    xi = jnp.arange(24, dtype=jnp.int32).reshape(2, 3, 4)
    yi = quantize_layer(xi, quantize=True)
    assert yi.dtype == xi.dtype and bool(jnp.all(yi == xi))

    print("KERNEL_OK")
</pallas_src>

<mosaic_0001>
module attributes {stable_mosaic.version = 11 : i64} {
  func.func @_floor_kernel(%arg0: i32, %arg1: memref<8x1024xf32, #tpu.memory_space<vmem>>, %arg2: memref<8x1024xf32, #tpu.memory_space<vmem>>) attributes {dimension_semantics = [#tpu.dimension_semantics<parallel>], iteration_bounds = array<i64: 1>, scalar_prefetch = 0 : i64, scratch_operands = 0 : i64, tpu.core_type = #tpu.core_type<tc>, window_params = [{transform_indices = @transform_0, window_bounds = array<i64: 8, 1024>}, {transform_indices = @transform_1, window_bounds = array<i64: 8, 1024>}]} {
    %c0 = arith.constant 0 : index
    %c0_0 = arith.constant 0 : index
    %0 = vector.load %arg1[%c0, %c0_0] : memref<8x1024xf32, #tpu.memory_space<vmem>>, vector<8x1024xf32>
    %1 = math.floor %0 : vector<8x1024xf32>
    %c0_1 = arith.constant 0 : index
    %c0_2 = arith.constant 0 : index
    %2 = vector.load %arg2[%c0_1, %c0_2] : memref<8x1024xf32, #tpu.memory_space<vmem>>, vector<8x1024xf32>
    tpu.vector_store %arg2[%c0_1, %c0_2], %1 {strides = array<i32>} : memref<8x1024xf32, #tpu.memory_space<vmem>>, vector<8x1024xf32>,
    return
  }
  func.func @transform_0(%arg0: i32) -> (i32, i32) {
    %c0_i32 = arith.constant 0 : i32
    %c0_i32_0 = arith.constant 0 : i32
    return %arg0, %c0_i32 : i32, i32
  }
  func.func @transform_1(%arg0: i32) -> (i32, i32) {
    %c0_i32 = arith.constant 0 : i32
    %c0_i32_0 = arith.constant 0 : i32
    return %arg0, %c0_i32 : i32, i32
  }
}

</mosaic_0001>

<bundles_post_ra>
// kernel: tpu_custom_call.1
= control target key start
LH: loop header
LB: loop body
LE: loop exit
PB: predicated region body
PF: predicated region fallthrough
CT: control target
= control target key end

     0   :  { %6 = vsyncpa [#allocation3], 0  ;;  %s138_s0 = inlined_call_operand.hbm [shape: f32[2,1024], index: 0, kind: input, shape index: {}]   ;;  %s139_s1 = inlined_call_operand.hbm [shape: f32[2,1024], index: 1, kind: output, shape index: {}]  }
   0x1   :  { %7 = vsyncpa [#allocation4], 0 }
   0x2   :  { %12 = vsyncadd [#allocation3], 768  ;;  %s112_s6 = smov [#allocation2]  }
   0x3   :  { %s13_s7 = sshll.u32 %s112_s6, 4  ;;  %s14_s7 = int_to_ptr.vmem [resolvable:$true] %s13_s7 }
   0x4   :  { %s76_s8 = scalar_lea.vmem %s14_s7, 256  ;;  %s80_s9 = scalar_lea.vmem %s14_s7, 1024 }
   0x5   :  { %p77_p0 = scmp.ne.s32.totalorder %s14_s7, %s76_s8  ;;  %p81_p1 = scmp.lt.s32.totalorder %s14_s7, %s14_s7 }
   0x6   :  { %p82_p2 = scmp.lt.s32.totalorder %s80_s9, %s76_s8 }
   0x8   :  { %p83_p3 = por %p82_p2, %p81_p1 }
   0xa   :  { %p84_p4 = pnand %p83_p3, %p77_p0 }
   0xc   :  { %87 = shalt.err (!%p84_p4)
}
   0xd   :  { %s113_s10 = smov 256   ;;  %s114_s11 = smov 16  }
   0xe   :  { %19 = dma.hbm_to_vmem [thread:$0]  %s138_s0, 256, %s14_s7, [#allocation3], %s113_s10, %s113_s10, %s114_s11  }
   0xf   :  { %108 = dma.done.wait [#allocation3], 1024  }
  0x10   :  { %109 = vsyncadd [#allocation3], 4294966272  ;;  %v23_v0 = vld [vmem:[#allocation2] sm:$0xff]  ;;  %v24_v1 = vld [vmem:[#allocation2 + $0x8] sm:$0xff] }
  0x11   :  { %v25_v2 = vld [vmem:[#allocation2 + $0x10] sm:$0xff]  ;;  %v31_v3 = vfloor.f32 %v23_v0  ;;  %v32_v4 = vfloor.f32 %v24_v1  ;;  %v26_v6 = vld [vmem:[#allocation2 + $0x18] sm:$0xff]  ;;  %v27_v7 = vld [vmem:[#allocation2 + $0x20] sm:$0xff] }
  0x12   :  { %v33_v5 = vfloor.f32 %v25_v2  ;;  %v28_v8 = vld [vmem:[#allocation2 + $0x28] sm:$0xff]  ;;  %v34_v9 = vfloor.f32 %v26_v6  ;;  %v35_v10 = vfloor.f32 %v27_v7  ;;  %v29_v12 = vld [vmem:[#allocation2 + $0x30] sm:$0xff]  ;;  %v30_v13 = vld [vmem:[#allocation2 + $0x38] sm:$0xff] }
  0x13   :  { %v36_v11 = vfloor.f32 %v28_v8  ;;  %39 = vst [vmem:[#allocation5] sm:$0xff] %v31_v3  ;;  %40 = vst [vmem:[#allocation5 + $0x8] sm:$0xff] %v32_v4  ;;  %v37_v14 = vfloor.f32 %v29_v12  ;;  %v38_v15 = vfloor.f32 %v30_v13 }
  0x14   :  { %41 = vst [vmem:[#allocation5 + $0x10] sm:$0xff] %v33_v5  ;;  %42 = vst [vmem:[#allocation5 + $0x18] sm:$0xff] %v34_v9 }
  0x15   :  { %43 = vst [vmem:[#allocation5 + $0x20] sm:$0xff] %v35_v10  ;;  %44 = vst [vmem:[#allocation5 + $0x28] sm:$0xff] %v36_v11 }
  0x16   :  { %45 = vst [vmem:[#allocation5 + $0x30] sm:$0xff] %v37_v14  ;;  %46 = vst [vmem:[#allocation5 + $0x38] sm:$0xff] %v38_v15 }
  0x17   :  { %51 = vsyncadd [#allocation4], 768  ;;  %s115_s0 = smov [#allocation5]  }
  0x18   :  { %s52_s14 = sshll.u32 %s115_s0, 4  ;;  %s53_s14 = int_to_ptr.vmem [resolvable:$true] %s52_s14 }
  0x19   :  { %s88_s15 = scalar_lea.vmem %s53_s14, 256  ;;  %s92_s16 = scalar_lea.vmem %s53_s14, 1024 }
  0x1a   :  { %p89_p5 = scmp.ne.s32.totalorder %s53_s14, %s88_s15  ;;  %p93_p6 = scmp.lt.s32.totalorder %s53_s14, %s53_s14 }
  0x1b   :  { %p94_p7 = scmp.lt.s32.totalorder %s92_s16, %s88_s15 }
  0x1d   :  { %p95_p8 = por %p94_p7, %p93_p6 }
  0x1f   :  { %p96_p9 = pnand %p95_p8, %p89_p5 }
  0x21   :  { %99 = shalt.err (!%p96_p9)
}
  0x22   :  { %58 = dma.vmem_to_hbm [thread:$0]  %s53_s14, 256, %s139_s1, [#allocation4], %s113_s10, %s113_s10, %s114_s11  }
  0x23   :  { %110 = dma.done.wait [#allocation4], 1024  }
  0x24   :  { %111 = vsyncadd [#allocation4], 4294966272 }
  0x25   :  { %62 = vsyncpa [#allocation3], 1 }
  0x26   :  { %63 = vsyncpa [#allocation4], 1 }

</bundles_post_ra>
